<compile_context>
chip_gen: v7x
topology: tpu7x:2x2x1
jax: 0.10.0
libtpu: 0.0.40
codegen_flags: <defaults>
</compile_context>

<pallas_src>
import functools

import jax
import jax.numpy as jnp
from jax import lax
from jax.experimental import pallas as pl
from jax.experimental.pallas import tpu as pltpu


def _primary_caps_kernel(p_ref, w_ref, b_ref, g_ref, o_ref, *, n_pad, bt):
    # p_ref: (Bt, K, Pp) bf16     w_ref: (C_out, K) bf16    b_ref: (C_out, 1) f32
    # g_ref: (C_out, C_out) f32   o_ref: (Bt, C_out, Pp) f32
    w = w_ref[...]
    b = b_ref[...]
    G = g_ref[...]
    # Zero-padded patch columns turn into `b` after the bias add; remove their contribution to
    # ||s||^2 with a loop-invariant correction instead of masking the full-width tile.
    pad_corr = (float(n_pad) * b) * b                                         # (C_out, 1)

    def body(i, carry):
        conv = jnp.dot(w, p_ref[i], preferred_element_type=jnp.float32) + b  # (C_out, Pp) MXU
        row_ss = jnp.sum(conv * conv, axis=-1, keepdims=True) - pad_corr     # XLU lane reduce
        ss = jnp.dot(G, row_ss, preferred_element_type=jnp.float32)          # per-capsule ||s||^2
        # squash: s * sqrt(ss) / (1 + ss)   (== ss/(1+ss) * s/||s|| for ss > 0)
        # TODO(synk): torch's `s[s == np.nan] = 0` is a no-op (NaN != NaN); for an exactly-zero
        # capsule this formulation yields 0 instead of the reference's 0/0 NaN.
        factor = jnp.sqrt(ss) / (1.0 + ss)
        o_ref[i] = conv * factor
        return carry

    lax.fori_loop(0, bt, body, None, unroll=True)


def _im2col_kp(x, kernel, stride):
    """x: (B, C, H, W) -> patches (B, K, P), K ordered (C_in, kh, kw), P = Ho*Wo."""
    B, C, H, W = x.shape
    Ho = (H - kernel) // stride + 1
    Wo = (W - kernel) // stride + 1
    cols = []
    for i in range(kernel):
        for j in range(kernel):
            cols.append(x[:, :, i:i + stride * Ho:stride, j:j + stride * Wo:stride])
    p = jnp.stack(cols, axis=2)                       # (B, C, k*k, Ho, Wo)
    p = p.reshape(B, C * kernel * kernel, Ho * Wo)    # (B, K, P) -- contiguous, no transpose
    return p, Ho, Wo


def primary_caps_forward(x, weight, bias, n_capsules, kernel, stride, *, batch_tile=None):
    """x: (B, C_in, H, W) f32, weight: (C_out, C_in, k, k) f32, bias: (C_out,) f32."""
    B, C_in, H, W = x.shape
    C_out = weight.shape[0]
    assert C_out % n_capsules == 0, "capsule_dimension * n_capsules must equal C_out"
    cap_dim = C_out // n_capsules

    patches, Ho, Wo = _im2col_kp(x, kernel, stride)   # (B, K, P) f32
    K = C_in * kernel * kernel
    P = Ho * Wo

    # Lane-dense padding of the spatial axis (full-width DMAs / unmasked stores).
    Pp = ((P + 127) // 128) * 128
    n_pad = Pp - P
    if n_pad:
        patches = jnp.pad(patches, ((0, 0), (0, 0), (0, n_pad)))

    # bf16 for the MXU operands only; bias / squash math stay f32.
    patches = patches.astype(jnp.bfloat16)
    w_flat = weight.reshape(C_out, K).astype(jnp.bfloat16)
    b2 = bias.reshape(C_out, 1).astype(jnp.float32)

    # Capsule group selector (block-diagonal ones), hoisted out of the kernel.
    gi = jnp.arange(C_out) // cap_dim
    G = (gi[:, None] == gi[None, :]).astype(jnp.float32)

    # Batch tiling: as many batches per grid step as possible while keeping >= 2 grid steps
    # (so both v7x TensorCores get work); single-TC v5e/v6e are insensitive to this choice.
    if batch_tile is None:
        divisors = [d for d in range(1, min(B, 8) + 1) if B % d == 0]
        pref = [d for d in divisors if B // d >= 2]
        bt = max(pref) if pref else max(divisors)
    else:
        bt = batch_tile
        assert B % bt == 0

    conv_caps = pl.pallas_call(
        functools.partial(_primary_caps_kernel, n_pad=n_pad, bt=bt),
        out_shape=jax.ShapeDtypeStruct((B, C_out, Pp), jnp.float32),
        grid=(B // bt,),
        in_specs=[
            pl.BlockSpec((bt, K, Pp), lambda i: (i, 0, 0)),
            pl.BlockSpec((C_out, K), lambda i: (0, 0)),
            pl.BlockSpec((C_out, 1), lambda i: (0, 0)),
            pl.BlockSpec((C_out, C_out), lambda i: (0, 0)),
        ],
        out_specs=pl.BlockSpec((bt, C_out, Pp), lambda i: (i, 0, 0)),
        compiler_params=pltpu.CompilerParams(
            dimension_semantics=("parallel",),
            vmem_limit_bytes=48 * 1024 * 1024,
        ),
    )(patches, w_flat, b2, G)

    if n_pad:
        conv_caps = conv_caps[:, :, :P]
    # NCHW conv output (B, C_out, Ho*Wo) -> torch's .view(B, n_caps, -1): metadata reshape.
    return conv_caps.reshape(B, n_capsules, cap_dim * P)


def _reference(x, weight, bias, n_capsules, kernel, stride):
    conv = jax.lax.conv_general_dilated(
        x, weight, window_strides=(stride, stride), padding="VALID",
        dimension_numbers=("NCHW", "OIHW", "NCHW"),
        precision=jax.lax.Precision.HIGHEST)
    conv = conv + bias.reshape(1, -1, 1, 1)
    B = x.shape[0]
    s = conv.reshape(B, n_capsules, -1)
    ss = jnp.sum(s * s, axis=-1, keepdims=True)
    norm = jnp.sqrt(ss)
    return (ss / (1.0 + ss)) * (s / norm)


if __name__ == "__main__":
    key = jax.random.PRNGKey(0)
    B, C_in, H, W = 2, 4, 16, 16
    n_capsules, cap_dim, kernel, stride = 8, 4, 3, 2
    C_out = n_capsules * cap_dim

    kx, kw, kb = jax.random.split(key, 3)
    x = jax.random.normal(kx, (B, C_in, H, W), dtype=jnp.float32)
    weight = 0.1 * jax.random.normal(kw, (C_out, C_in, kernel, kernel), dtype=jnp.float32)
    bias = 0.1 * jax.random.normal(kb, (C_out,), dtype=jnp.float32)

    out = primary_caps_forward(x, weight, bias, n_capsules, kernel, stride)
    out = jax.block_until_ready(out)

    Ho = (H - kernel) // stride + 1
    Wo = (W - kernel) // stride + 1
    assert out.shape == (B, n_capsules, cap_dim * Ho * Wo)

    ref = _reference(x, weight, bias, n_capsules, kernel, stride)
    # bf16 MXU operands (per the perf review) => ~1e-2-level deviation vs the f32 reference.
    assert jnp.allclose(out, ref, atol=1e-2, rtol=1e-2)

    print("KERNEL_OK")
</pallas_src>

<mosaic_0001>
module attributes {stable_mosaic.version = 11 : i64} {
  func.func @_primary_caps_kernel(%arg0: i32, %arg1: memref<1x36x128xbf16, #tpu.memory_space<vmem>>, %arg2: memref<32x36xbf16, #tpu.memory_space<vmem>>, %arg3: memref<32x1xf32, #tpu.memory_space<vmem>>, %arg4: memref<32x32xf32, #tpu.memory_space<vmem>>, %arg5: memref<1x32x128xf32, #tpu.memory_space<vmem>>) attributes {dimension_semantics = [#tpu.dimension_semantics<parallel>], iteration_bounds = array<i64: 2>, scalar_prefetch = 0 : i64, scratch_operands = 0 : i64, tpu.core_type = #tpu.core_type<tc>, window_params = [{transform_indices = @transform_0, window_bounds = array<i64: 1, 36, 128>}, {pipeline_mode = #tpu.pipeline_mode<synchronous>, transform_indices = @transform_1, window_bounds = array<i64: 32, 36>}, {pipeline_mode = #tpu.pipeline_mode<synchronous>, transform_indices = @transform_2, window_bounds = array<i64: 32, 1>}, {pipeline_mode = #tpu.pipeline_mode<synchronous>, transform_indices = @transform_3, window_bounds = array<i64: 32, 32>}, {transform_indices = @transform_4, window_bounds = array<i64: 1, 32, 128>}]} {
    %c0 = arith.constant 0 : index
    %c0_0 = arith.constant 0 : index
    %0 = vector.load %arg2[%c0, %c0_0] : memref<32x36xbf16, #tpu.memory_space<vmem>>, vector<32x36xbf16>
    %c0_1 = arith.constant 0 : index
    %c0_2 = arith.constant 0 : index
    %1 = vector.load %arg3[%c0_1, %c0_2] : memref<32x1xf32, #tpu.memory_space<vmem>>, vector<32x1xf32>
    %c0_3 = arith.constant 0 : index
    %c0_4 = arith.constant 0 : index
    %2 = vector.load %arg4[%c0_3, %c0_4] : memref<32x32xf32, #tpu.memory_space<vmem>>, vector<32x32xf32>
    %cst = arith.constant 7.900000e+01 : f32
    %3 = vector.broadcast %cst : f32 to vector<32x1xf32>
    %4 = arith.mulf %3, %1 : vector<32x1xf32>
    %5 = arith.mulf %4, %1 : vector<32x1xf32>
    %c0_i32 = arith.constant 0 : i32
    %6 = arith.index_cast %c0_i32 : i32 to index
    %c0_5 = arith.constant 0 : index
    %c0_6 = arith.constant 0 : index
    %7 = vector.load %arg1[%6, %c0_5, %c0_6] : memref<1x36x128xbf16, #tpu.memory_space<vmem>>, vector<1x36x128xbf16>
    %8 = vector.shape_cast %7 : vector<1x36x128xbf16> to vector<36x128xbf16>
    %cst_7 = arith.constant dense<0.000000e+00> : vector<32x128xf32>
    %9 = tpu.matmul %0, %8, %cst_7 {dimension_numbers = #tpu.dot_dimension_numbers<[1], [0], [0], [1], [0, 0, 1, 1], [], []>} : vector<32x36xbf16>, vector<36x128xbf16>, vector<32x128xf32> -> vector<32x128xf32>
    %10 = vector.broadcast %1 : vector<32x1xf32> to vector<32x128xf32>
    %11 = arith.addf %9, %10 : vector<32x128xf32>
    %12 = arith.mulf %11, %11 : vector<32x128xf32>
    %cst_8 = arith.constant dense<0.000000e+00> : vector<32xf32>
    %13 = vector.multi_reduction <add>, %12, %cst_8 [1] : vector<32x128xf32> to vector<32xf32>
    %14 = vector.shape_cast %13 : vector<32xf32> to vector<32x1xf32>
    %15 = arith.subf %14, %5 : vector<32x1xf32>
    %cst_9 = arith.constant dense<0.000000e+00> : vector<32x1xf32>
    %16 = tpu.matmul %2, %15, %cst_9 {dimension_numbers = #tpu.dot_dimension_numbers<[1], [0], [0], [1], [0, 0, 1, 1], [], []>} : vector<32x32xf32>, vector<32x1xf32>, vector<32x1xf32> -> vector<32x1xf32>
    %17 = math.sqrt %16 : vector<32x1xf32>
    %cst_10 = arith.constant 1.000000e+00 : f32
    %18 = vector.broadcast %cst_10 : f32 to vector<32x1xf32>
    %19 = arith.addf %18, %16 : vector<32x1xf32>
    %20 = arith.divf %17, %19 : vector<32x1xf32>
    %21 = vector.broadcast %20 : vector<32x1xf32> to vector<32x128xf32>
    %22 = arith.mulf %11, %21 : vector<32x128xf32>
    %23 = arith.index_cast %c0_i32 : i32 to index
    %c0_11 = arith.constant 0 : index
    %c0_12 = arith.constant 0 : index
    %24 = vector.load %arg5[%23, %c0_11, %c0_12] : memref<1x32x128xf32, #tpu.memory_space<vmem>>, vector<1x32x128xf32>
    %25 = vector.shape_cast %24 : vector<1x32x128xf32> to vector<32x128xf32>
    %26 = vector.shape_cast %22 : vector<32x128xf32> to vector<1x32x128xf32>
    tpu.vector_store %arg5[%23, %c0_11, %c0_12], %26 {strides = array<i32>} : memref<1x32x128xf32, #tpu.memory_space<vmem>>, vector<1x32x128xf32>,
    %c1_i32 = arith.constant 1 : i32
    return
  }
  func.func @transform_0(%arg0: i32) -> (i32, i32, i32) {
    %c0_i32 = arith.constant 0 : i32
    %c0_i32_0 = arith.constant 0 : i32
    %c0_i32_1 = arith.constant 0 : i32
    return %arg0, %c0_i32, %c0_i32_0 : i32, i32, i32
  }
  func.func @transform_1(%arg0: i32) -> (i32, i32) {
    %c0_i32 = arith.constant 0 : i32
    %c0_i32_0 = arith.constant 0 : i32
    %c0_i32_1 = arith.constant 0 : i32
    return %c0_i32, %c0_i32_0 : i32, i32
  }
  func.func @transform_2(%arg0: i32) -> (i32, i32) {
    %c0_i32 = arith.constant 0 : i32
    %c0_i32_0 = arith.constant 0 : i32
    %c0_i32_1 = arith.constant 0 : i32
    return %c0_i32, %c0_i32_0 : i32, i32
  }
  func.func @transform_3(%arg0: i32) -> (i32, i32) {
    %c0_i32 = arith.constant 0 : i32
    %c0_i32_0 = arith.constant 0 : i32
    %c0_i32_1 = arith.constant 0 : i32
    return %c0_i32, %c0_i32_0 : i32, i32
  }
  func.func @transform_4(%arg0: i32) -> (i32, i32, i32) {
    %c0_i32 = arith.constant 0 : i32
    %c0_i32_0 = arith.constant 0 : i32
    %c0_i32_1 = arith.constant 0 : i32
    return %arg0, %c0_i32, %c0_i32_0 : i32, i32, i32
  }
}

</mosaic_0001>

<bundles_post_ra>
// kernel: tpu_custom_call.1
= control target key start
LH: loop header
LB: loop body
LE: loop exit
PB: predicated region body
PF: predicated region fallthrough
CT: control target
= control target key end

     0   :  { %9 = vsyncpa [#allocation3], 0  ;;  %s972_s0 = inlined_call_operand.vmem [shape: bf16[2,36,128], index: 0, kind: input, shape index: {}]   ;;  %s973_s1 = inlined_call_operand.vmem [shape: bf16[32,36], index: 1, kind: input, shape index: {}]   ;;  %s974_s2 = inlined_call_operand.vmem [shape: f32[32,1], index: 2, kind: input, shape index: {}]   ;;  %s975_s3 = inlined_call_operand.vmem [shape: f32[32,32], index: 3, kind: input, shape index: {}]   ;;  %s976_s4 = inlined_call_operand.hbm [shape: f32[2,32,128], index: 4, kind: output, shape index: {}]  }
   0x1   :  { %11 = vsyncpa [#allocation3 + $0x1], 0  ;;  %s813_s15 = smov 0   ;;  %s815_s16 = smov 0  }
   0x2   :  { %s817_s17 = smov 0   ;;  %s819_s18 = smov 0  }
   0x3 LB: > { %s834_s19 = sadd.s32 4294967295, %s782_s18   ;;  %s585_s20 = sadd.s32 4294967294, %s782_s18   ;;  %s782_s18 = sphi %s819_s18, %s982_s18   ;;  %s778_s17 = sphi %s817_s17, %s981_s17   ;;  %s774_s16 = sphi %s815_s16, %s980_s16   ;;  %s770_s15 = sphi %s813_s15, %s979_s15  }
   0x4   : > { %s838_s21 = sadd.s32 1, %s782_s18   ;;  %s113_s22 = sadd.s32 1, %s778_s17 }
   0x5   : > { %s110_s23 = ssub.s32 %s782_s18, %s838_s21  ;;  %p123_p0 = scmp.ne.s32.totalorder %s778_s17, %s774_s16 }
   0x6   : > { %p111_p1 = scmp.eq.s32.totalorder %s110_s23, 0  ;;  %p124_p2 = scmp.eq.s32.totalorder %s834_s19, 1 }
   0x7   : > { %p129_p3 = scmp.ne.s32.totalorder %s774_s16, %s770_s15  ;;  %p130_p4 = scmp.eq.s32.totalorder %s585_s20, 1 }
   0x8   : > { %s849_s24 = scalar_select %p111_p1, %s778_s17, %s113_s22  }
   0x9   : > { %p851_p5 = por %p124_p2, %p123_p0  ;;  %p855_p6 = por %p130_p4, %p129_p3 }
   0xa   : > { %p588_p7 = scmp.ge.s32.totalorder %s782_s18, 1  ;;  %p165_p8 = scmp.lt.s32.totalorder %s782_s18, 3 }
   0xc   : > { %p166_p9 = pnand %p588_p7, %p165_p8 }
   0xd   : > { %p191_p10 = scmp.lt.s32.totalorder (!%p166_p9), %s834_s19, 1  ;;  %v702_v0 = vld [vmem:[%s973_s1] sm:$0xff] (!%p166_p9)   ;;  %vm267_vm0 = vcmask (!%p166_p9), 293888   ;;  %v203_v2 = vld [vmem:[%s974_s2 + $0x10] sm:$0xff] (!%p166_p9)  ;;  %v784_v3 = vmov (!%p166_p9), 0   ;;  %v202_v4 = vld [vmem:[%s974_s2 + $0x8] sm:$0xff] (!%p166_p9) }
   0xe   : > { %169 = sbr.rel (%p166_p9) target bundleno = 798 (0x31e), region = 36  ;;  %v201_v1 = vld [vmem:[%s974_s2] sm:$0xff] (!%p166_p9)  ;;  %627 = vmatprep.mubr.msk.bf16.mxu0 (!%p166_p9), %vm267_vm0, %v702_v0  ;;  %697 = vset.pattern.permute.xlu0 (!%p166_p9), %v784_v3  ;;  %v204_v5 = vld [vmem:[%s974_s2 + $0x18] sm:$0xff] (!%p166_p9)  ;;  %vm274_vm1 = vcmask (!%p166_p9), 1041408   ;;  %v703_v10 = vld [vmem:[%s973_s1 + $0x8] sm:$0xff] (!%p166_p9)   ;;  %vm343_vm2 = vcmask (!%p166_p9), 261120  }
   0xf   : > { %698 = vset.pattern.permute.xlu1 (!%p166_p9), %v784_v3  ;;  %224 = vperm.xlu0 (!%p166_p9), %697, %v201_v1   ;;  %v205_v27 = vld [vmem:[%s975_s3] sm:$0xff] (!%p166_p9)  ;;  %v209_v28 = vmul.f32 (!%p166_p9), 79.0, %v201_v1  ;;  %v210_v29 = vmul.f32 (!%p166_p9), 79.0, %v202_v4  ;;  %v211_v33 = vmul.f32 (!%p166_p9), 79.0, %v203_v2  ;;  %v212_v34 = vmul.f32 (!%p166_p9), 79.0, %v204_v5  ;;  %v206_v46 = vld [vmem:[%s975_s3 + $0x8] sm:$0xff] (!%p166_p9) }
  0x10   : > { %234 = vperm.xlu1 (!%p166_p9), %698, %v203_v2   ;;  %639 = vmatprep.mubr.msk.f32.mxu1 (!%p166_p9), %vm343_vm2, %v205_v27  ;;  %v207_v47 = vld [vmem:[%s975_s3 + $0x10] sm:$0xff] (!%p166_p9)  ;;  %v208_v48 = vld [vmem:[%s975_s3 + $0x18] sm:$0xff] (!%p166_p9)  ;;  %s188_s9 = sand.u32 (!%p166_p9), 1, %s774_s16  }
  0x11   : > { %v213_v30 = vmul.f32 (!%p166_p9), %v209_v28, %v201_v1  ;;  %v214_v31 = vmul.f32 (!%p166_p9), %v210_v29, %v202_v4  ;;  %v215_v39 = vmul.f32 (!%p166_p9), %v211_v33, %v203_v2  ;;  %v216_v41 = vmul.f32 (!%p166_p9), %v212_v34, %v204_v5  ;;  %s589_s10 = sshll.u32 (!%p166_p9), %s188_s9, 5  ;;  %s931_s23 = scalar_lea.sflag (!%p166_p9), [#allocation3], %s188_s9 }
  0x12   : > { %s190_s11 = scalar_lea.vmem (!%p166_p9), [#allocation2], %s589_s10 }
  0x13   : > { %229 = vperm.xlu0 (!%p166_p9), %697, %v202_v4   ;;  %s523_s12 = sshll.u32 (!%p166_p9), %s190_s11, 4  ;;  %s923_s12 = int_to_ptr.vmem [resolvable:$true] %s523_s12 }
  0x14   : > { %239 = vperm.xlu1 (!%p166_p9), %698, %v204_v5   ;;  %s720_s27 = scalar_lea.vmem (!%p166_p9), %s923_s12, 512 }
  0x15   : > { %s192_s29 = scalar_select %p191_p10, %s834_s19, 1 }
  0x16   : > { %p721_p11 = scmp.ne.s32.totalorder %s923_s12, %s720_s27 }
  0x17   : > { %s654_s8 = smul.u32 20, %s192_s29 }
  0x18   : > { %p722_p12 = pnand %p721_p11, %p851_p5 }
  0x19   : > { %s195_s13 = scalar_lea.vmem %s972_s0, %s654_s8 }
  0x1a   : > { %v699_v6 = vld [vmem:[%s195_s13] sm:$0xff]   ;;  %v700_v7 = vld [vmem:[%s195_s13 + $0x8] sm:$0xff]   ;;  %v701_v8 = vld [vmem:[%s195_s13 + $0x10] ss:$0 sps:$4 sm:$0x33]   ;;  %s607_s13 = sshll.u32 %s834_s19, 9  ;;  %p723_p13 = pneg %p722_p12 }
  0x1b   : > { %621 = vmatprep.subr.bf16.mxu0 %v699_v6  ;;  %v276_v9 = vsel %vm274_vm1, %v701_v8, 0  ;;  %s929_s22 = scalar_lea.hbm %s976_s4, %s607_s13  ;;  %s785_s19 = smov [#allocation2]  }
  0x1c   : > { %622 = vmatpush3.bf16.msra.mxu0 %v699_v6  ;;  %s724_s28 = sshll.u32 %s785_s19, 4  ;;  %s725_s28 = int_to_ptr.vmem [resolvable:$false] %s724_s28 }
  0x1d   : > { %623 = vmatprep.subr.bf16.mxu0 %v700_v7  ;;  %s726_s29 = scalar_lea.vmem %s725_s28, 1024  ;;  %p727_p0 = scmp.lt.s32.totalorder %s923_s12, %s725_s28 }
  0x1e   : > { %p728_p1 = scmp.lt.s32.totalorder %s726_s29, %s720_s27 }
  0x20   : > { %624 = vmatpush3.bf16.msra.mxu0 %v700_v7  ;;  %p729_p2 = por %p728_p1, %p727_p0 }
  0x21   : > { %653 = vmatprep.subr.msk.bf16.mxu0 %vm274_vm1, %v701_v8 }
  0x22   : > { %p730_p3 = pnand %p729_p2, %p723_p13 }
  0x24   : > { %626 = vmatpush3.bf16.msra.mxu0 %v276_v9 }
  0x27   : > { %628 = vmatmul.mubr.msk.bf16.vlgmr.msra.gmra.mrb[0].mxu0 %vm267_vm0, %v703_v10 }
  0x8e   : > { %v225_v11 = vpop.permute.xlu0 %224 }
  0x8f   : > { %v235_v12 = vpop.permute.xlu1 %234 }
  0x92   : > { %v230_v17 = vpop.permute.xlu0 %229 }
  0x93   : > { %v240_v22 = vpop.permute.xlu1 %239 }
  0xfa   : > { %v629_v13 = vpop.f32.mrb[0].mxu0 }
  0xfb   : > { %v312_v14 = vpop.f32.mrb[1].mxu0  ;;  %v888_v19 = vadd.f32 %v629_v13, %v235_v12 }
  0xfc   : > { %v886_v15 = vadd.f32 %v312_v14, %v225_v11  ;;  %v630_v16 = vpop.f32.mrb[2].mxu0 }
  0xfd   : > { %v315_v18 = vpop.f32.mrb[3].mxu0  ;;  %v896_v24 = vadd.f32 %v630_v16, %v240_v22  ;;  %v329_v25 = vmul.f32 %v888_v19, %v888_v19 }
  0xfe   : > { %v890_v20 = vadd.f32 %v315_v18, %v230_v17  ;;  %v327_v21 = vmul.f32 %v886_v15, %v886_v15 }
  0xff   : > { %v330_v26 = vmul.f32 %v896_v24, %v896_v24 }
 0x100   : > { %331 = vadd.xlane.f32.xlu0 %v327_v21  ;;  %v328_v23 = vmul.f32 %v890_v20, %v890_v20 }
 0x102   : > { %333 = vadd.xlane.f32.xlu1 %v328_v23 }
 0x104   : > { %335 = vadd.xlane.f32.xlu0 %v329_v25 }
 0x108   : > { %337 = vadd.xlane.f32.xlu0 %v330_v26 }
 0x18d   : > { %v332_v32 = vpop.xlane.xlu0 %331 }
 0x18e   : > { %v339_v36 = vsub.f32 %v332_v32, %v213_v30 }
 0x18f   : > { %v334_v35 = vpop.xlane.xlu1 %333 }
 0x190   : > { %v340_v37 = vsub.f32 %v334_v35, %v214_v31 }
 0x191   : > { %v336_v38 = vpop.xlane.xlu0 %335 }
 0x192   : > { %v645_v40 = vpack.c.bf16 %v340_v37, %v339_v36  ;;  %v341_v43 = vsub.f32 %v336_v38, %v215_v39 }
 0x194   : > { %646 = vmatprep.subr.bf16.mxu1 %v645_v40 }
 0x195   : > { %648 = vmatpush3.bf16.msra.mxu1 %v645_v40  ;;  %v338_v42 = vpop.xlane.xlu0 %337 }
 0x196   : > { %v342_v44 = vsub.f32 %v338_v42, %v216_v41 }
 0x198   : > { %v649_v45 = vpack.c.bf16 %v342_v44, %v341_v43 }
 0x19a   : > { %650 = vmatprep.subr.bf16.mxu1 %v649_v45 }
 0x19b   : > { %652 = vmatpush3.bf16.msra.mxu1 %v649_v45 }
 0x19e   : > { %640 = vmatmul.mubr.msk.f32.vlgmr.msra.gmra.mrb[0].mxu1 %vm343_vm2, %v206_v46 }
 0x19f   : > { %642 = vmatprep.mubr.msk.f32.mxu1 %vm343_vm2, %v207_v47 }
 0x1a2   : > { %643 = vmatmul.mubr.msk.f32.gmra.mrb[2].mxu1 %vm343_vm2, %v208_v48 }
 0x271   : > { %v641_v49 = vpop.f32.mrb[0].mxu1 }
 0x272   : > { %704 = vrsqrt.f32 %v641_v49  ;;  %v422_v50 = vpop.f32.mrb[1].mxu1  ;;  %v470_v51 = vadd.f32 1.0, %v641_v49  ;;  %vm450_vm3 = vcmp.eq.f32.partialorder %v641_v49, inf  ;;  %v453_v60 = vand.u32 2147483648, %v641_v49 }
 0x273   : > { %706 = vrsqrt.f32 %v422_v50  ;;  %v469_v52 = vadd.f32 1.0, %v422_v50  ;;  %vm452_vm4 = vcmp.eq.f32.partialorder %v641_v49, 0.0  ;;  %vm443_vm5 = vcmp.eq.f32.partialorder %v422_v50, inf }
 0x274   : > { %708 = vrcp.f32 %v470_v51  ;;  %v446_v0 = vand.u32 2147483648, %v422_v50  ;;  %vm445_vm6 = vcmp.eq.f32.partialorder %v422_v50, 0.0 }
 0x275   : > { %v644_v53 = vpop.f32.mrb[2].mxu1 }
 0x276   : > { %710 = vrsqrt.f32 %v644_v53  ;;  %v432_v54 = vpop.f32.mrb[3].mxu1  ;;  %v472_v57 = vadd.f32 1.0, %v644_v53  ;;  %vm464_vm9 = vcmp.eq.f32.partialorder %v644_v53, inf  ;;  %v467_v18 = vand.u32 2147483648, %v644_v53 }
 0x277   : > { %712 = vrsqrt.f32 %v432_v54  ;;  %v471_v55 = vadd.f32 1.0, %v432_v54  ;;  %vm457_vm7 = vcmp.eq.f32.partialorder %v432_v54, inf  ;;  %v460_v11 = vand.u32 2147483648, %v432_v54 }
 0x278   : > { %714 = vrcp.f32 %v469_v52  ;;  %vm459_vm8 = vcmp.eq.f32.partialorder %v432_v54, 0.0  ;;  %vm466_vm10 = vcmp.eq.f32.partialorder %v644_v53, 0.0 }
 0x279   : > { %716 = vrcp.f32 %v471_v55 }
 0x27a   : > { %718 = vrcp.f32 %v472_v57 }
 0x27c   : > { %v705_v56 = vpop.eup %704 }
 0x27d   : > { %v707_v58 = vpop.eup %706  ;;  %v449_v59 = vmul.f32 %v705_v56, %v641_v49 }
 0x27e   : > { %v442_v61 = vmul.f32 %v707_v58, %v422_v50  ;;  %v709_v62 = vpop.eup %708 }
 0x27f   : > { %v451_v63 = vsel %vm450_vm3, %v641_v49, %v449_v59 }
 0x280   : > { %v711_v1 = vpop.eup %710  ;;  %v454_v2 = vsel %vm452_vm4, %v453_v60, %v451_v63  ;;  %v444_v3 = vsel %vm443_vm5, %v422_v50, %v442_v61 }
 0x281   : > { %v713_v4 = vpop.eup %712  ;;  %v476_v5 = vmul.f32 %v709_v62, %v454_v2  ;;  %v447_v6 = vsel %vm445_vm6, %v446_v0, %v444_v3  ;;  %v463_v7 = vmul.f32 %v711_v1, %v644_v53 }
 0x282   : > { %v715_v8 = vpop.eup %714  ;;  %v456_v9 = vmul.f32 %v713_v4, %v432_v54 }
 0x283   : > { %488 = vperm.xlu0 %697, %v476_v5   ;;  %v474_v10 = vmul.f32 %v715_v8, %v447_v6  ;;  %v717_v13 = vpop.eup %716  ;;  %v465_v16 = vsel %vm464_vm9, %v644_v53, %v463_v7 }
 0x284   : > { %v458_v12 = vsel %vm457_vm7, %v432_v54, %v456_v9  ;;  %v468_v21 = vsel %vm466_vm10, %v467_v18, %v465_v16  ;;  %v719_v22 = vpop.eup %718 }
 0x285   : > { %483 = vperm.xlu1 %698, %v474_v10   ;;  %v461_v14 = vsel %vm459_vm8, %v460_v11, %v458_v12  ;;  %v480_v23 = vmul.f32 %v719_v22, %v468_v21 }
 0x286   : > { %v478_v17 = vmul.f32 %v717_v13, %v461_v14 }
 0x289   : > { %493 = vperm.xlu1 %698, %v478_v17  }
 0x28d   : > { %498 = vperm.xlu1 %698, %v480_v23  }
 0x302   : > { %v489_v25 = vpop.permute.xlu0 %488 }
 0x303   : > { %v502_v26 = vmul.f32 %v489_v25, %v890_v20 }
 0x304   : > { %v484_v27 = vpop.permute.xlu1 %483 }
 0x305   : > { %506 = vst [vmem:[%s190_s11 + $0x8] sm:$0xff] %v502_v26  ;;  %v501_v28 = vmul.f32 %v484_v27, %v886_v15 }
 0x307   : > { %505 = vst [vmem:[%s190_s11] sm:$0xff] %v501_v28 }
 0x308   : > { %v494_v29 = vpop.permute.xlu1 %493 }
 0x309   : > { %v503_v30 = vmul.f32 %v494_v29, %v888_v19 }
 0x30b   : > { %507 = vst [vmem:[%s190_s11 + $0x10] sm:$0xff] %v503_v30 }
 0x30c   : > { %v499_v31 = vpop.permute.xlu1 %498 }
 0x30d   : > { %v504_v20 = vmul.f32 %v499_v31, %v896_v24 }
 0x30f   : > { %508 = vst [vmem:[%s190_s11 + $0x18] sm:$0xff] %v504_v20 }
 0x310   : > { %733 = shalt.err (!%p730_p3)
}
 0x311   : > { %s734_s30 = scalar_lea.hbm %s929_s22, 512  ;;  %s738_s7 = scalar_lea.hbm %s976_s4, 1024 }
 0x312   : > { %p735_p4 = scmp.ne.s32.totalorder %s929_s22, %s734_s30  ;;  %p739_p9 = scmp.lt.u32.totalorder %s929_s22, %s976_s4 }
 0x313   : > { %p740_p10 = scmp.lt.u32.totalorder %s738_s7, %s734_s30  ;;  %p742_p12 = scmp.lt.u32.totalorder %s734_s30, %s929_s22 }
 0x314   : > { %p736_p7 = pnand %p735_p4, %p851_p5 }
 0x315   : > { %p741_p11 = por %p740_p10, %p739_p9 }
 0x316   : > { %p737_p8 = pneg %p736_p7 }
 0x317   : > { %p743_p13 = por %p742_p12, %p741_p11 }
 0x319   : > { %p744_p0 = pnand %p743_p13, %p737_p8 }
 0x31b   : > { %747 = shalt.err (!%p744_p0)
}
 0x31c   : > { %s786_s10 = smov 128   ;;  %s787_s11 = smov 8  }
 0x31d   : > { %655 = dma.vmem_to_hbm [thread:$0]  (%p851_p5), %s923_s12, 512, %s929_s22, %s931_s23, %s786_s10, %s786_s10, %s787_s11  }
 0x31e PF: > { %p661_p1 = scmp.ge.s32.totalorder %s782_s18, 2  ;;  %s538_s13 = sand.u32 1, %s770_s15  }
 0x31f   : > { %s539_s14 = scalar_lea.sflag [#allocation3], %s538_s13 }
 0x320   : > { %p658_p2 = pnand %p661_p1, %p855_p6 }
 0x322   : > { %765 = dma.done.wait (!%p658_p2), %s539_s14, 512  }
 0x323   : > { %767 = vsyncadd (!%p658_p2), %s539_s14, 4294966784  ;;  %p14_p3 = scmp.ge.s32.totalorder %s838_s21, 4   ;;  %s979_s15 = smov %s774_s16 }
 0x324   : > { %s980_s16 = smov %s778_s17  ;;  %s981_s17 = smov %s849_s24 }
 0x325   : > { %s982_s18 = smov %s838_s21  ;;  %16 = sbr.rel (!%p14_p3) target bundleno = 3 (0x3), region = 71 }
 0x32c   :  { %544 = vsyncpa [#allocation3], 1 }
 0x32d   :  { %546 = vsyncpa [#allocation3 + $0x1], 1 }

</bundles_post_ra>
